<compile_context>
chip_gen: v5e
topology: v5e:2x2
jax: 0.10.0
libtpu: 0.0.40
codegen_flags: <defaults>
</compile_context>

<pallas_src>
import math
import functools

import jax
import jax.numpy as jnp
from jax.experimental import pallas as pl
from jax.experimental.pallas import tpu as pltpu


def _pos_enc_kernel(x_ref, pe_ref, *rest, p, training):
    # x_ref: (TILE_S, B, D); pe_ref: (TILE_S, D); optional bits_ref: (TILE_S, B, D).
    if training:
        bits_ref, o_ref = rest
    else:
        (o_ref,) = rest

    # Compute in f32 (cheap on the VPU; avoids bf16 pack/unpack on v5e),
    # broadcast pe over the batch (sublane) axis.
    y = x_ref[...].astype(jnp.float32) + pe_ref[...][:, None, :]

    if training:
        # Inverted dropout with an integer threshold compare: keep iff
        # bits >= p * 2^32  (P(keep) = 1 - p).  No shift / int->float convert.
        drop_threshold = min(int(round(p * 2.0 ** 32)), 2 ** 32 - 1)
        keep = bits_ref[...] >= jnp.uint32(drop_threshold)
        y = jnp.where(keep, y * (1.0 / (1.0 - p)), 0.0)

    o_ref[...] = y.astype(o_ref.dtype)


def make_positional_encoding_table(d_model, max_len=5000):
    """Deterministic buffer, identical math to the PyTorch __init__ (kept f32)."""
    position = jnp.arange(max_len, dtype=jnp.float32)[:, None]              # (L, 1)
    div_term = jnp.exp(
        jnp.arange(0, d_model, 2, dtype=jnp.float32) * (-math.log(10000.0) / d_model)
    )                                                                        # (D/2,)
    pe = jnp.zeros((max_len, d_model), dtype=jnp.float32)
    pe = pe.at[:, 0::2].set(jnp.sin(position * div_term))
    pe = pe.at[:, 1::2].set(jnp.cos(position * div_term))
    return pe


def _choose_tile_s(S, B, D, itemsize, target_bytes=2 * 1024 * 1024):
    """Pick a seq-tile so one x block is ~target_bytes (multiple of 8 rows)."""
    bytes_per_row = max(1, B * D * itemsize)
    rows = max(1, target_bytes // bytes_per_row)
    if rows >= S:
        return S                     # whole array in one block (small case)
    return max(8, (int(rows) // 8) * 8)


def positional_encoding_forward(x, pe_table, *, p=0.1, training=False, rng_key=None):
    """x: (S, B, D).  Returns x + pe[:S] (plus inverted dropout if training)."""
    S, B, D = x.shape
    pe_slice = pe_table[:S].astype(jnp.float32)                             # (S, D)

    tile_s = _choose_tile_s(S, B, D, jnp.dtype(x.dtype).itemsize)
    num_tiles = pl.cdiv(S, tile_s)
    use_dropout = bool(training) and float(p) > 0.0

    # NOTE: the block's last two dims are (B, D) == the full array dims, so the
    # (8,128) constraint is always satisfied.  For realistic transformer shapes
    # (D a multiple of 128, B >= 8) the tiles are lane/sublane dense; only the
    # toy shapes under-fill vregs.
    in_specs = [
        pl.BlockSpec((tile_s, B, D), lambda i: (i, 0, 0)),   # x
        pl.BlockSpec((tile_s, D), lambda i: (i, 0)),          # pe (B× smaller DMA)
    ]
    inputs = [x, pe_slice]

    if use_dropout:
        if rng_key is None:
            rng_key = jax.random.PRNGKey(0)
        # Host/XLA-side random bits (portable; not bit-compatible with torch RNG).
        bits = jax.random.bits(rng_key, shape=x.shape, dtype=jnp.uint32)
        in_specs.append(pl.BlockSpec((tile_s, B, D), lambda i: (i, 0, 0)))
        inputs.append(bits)

    kernel = functools.partial(_pos_enc_kernel, p=float(p), training=use_dropout)

    return pl.pallas_call(
        kernel,
        out_shape=jax.ShapeDtypeStruct((S, B, D), x.dtype),
        grid=(num_tiles,),
        in_specs=in_specs,
        out_specs=pl.BlockSpec((tile_s, B, D), lambda i: (i, 0, 0)),
        compiler_params=pltpu.CompilerParams(
            dimension_semantics=("parallel",),      # shard S tiles across TCs (v7x)
            vmem_limit_bytes=32 * 1024 * 1024,      # explicit; safe on v5e/v6e/v7x
        ),
    )(*inputs)


if __name__ == "__main__":
    # Small shapes consistent with the module: seq=8, batch=2, d_model=32.
    S, B, D = 8, 2, 32
    key = jax.random.PRNGKey(0)
    x = jax.random.normal(key, (S, B, D), dtype=jnp.float32)

    pe_table = make_positional_encoding_table(d_model=D, max_len=5000)

    # Eval-mode forward (dropout is identity) — exact check against reference.
    out = jax.block_until_ready(
        positional_encoding_forward(x, pe_table, p=0.1, training=False))
    ref = x + pe_table[:S][:, None, :]
    assert out.shape == (S, B, D)
    assert jnp.allclose(out, ref, atol=1e-6, rtol=1e-6), "eval mismatch vs reference"

    # Train-mode forward: bits are generated deterministically from the key,
    # so the dropout result can be checked exactly against a JAX reference.
    p = 0.1
    drop_key = jax.random.PRNGKey(42)
    out_train = jax.block_until_ready(
        positional_encoding_forward(x, pe_table, p=p, training=True, rng_key=drop_key))
    bits = jax.random.bits(drop_key, shape=(S, B, D), dtype=jnp.uint32)
    thr = jnp.uint32(min(int(round(p * 2.0 ** 32)), 2 ** 32 - 1))
    scale = 1.0 / (1.0 - p)
    ref_train = jnp.where(bits >= thr, (x + pe_table[:S][:, None, :]) * scale, 0.0)
    assert out_train.shape == (S, B, D)
    assert jnp.allclose(out_train, ref_train, atol=1e-5, rtol=1e-5), "train mismatch"

    print("KERNEL_OK")
</pallas_src>

<mosaic_0001>
module attributes {stable_mosaic.version = 11 : i64} {
  func.func @_pos_enc_kernel(%arg0: i32, %arg1: memref<8x2x32xf32, #tpu.memory_space<vmem>>, %arg2: memref<8x32xf32, #tpu.memory_space<vmem>>, %arg3: memref<8x2x32xf32, #tpu.memory_space<vmem>>) attributes {dimension_semantics = [#tpu.dimension_semantics<parallel>], iteration_bounds = array<i64: 1>, scalar_prefetch = 0 : i64, scratch_operands = 0 : i64, tpu.core_type = #tpu.core_type<tc>, window_params = [{transform_indices = @transform_0, window_bounds = array<i64: 8, 2, 32>}, {transform_indices = @transform_1, window_bounds = array<i64: 8, 32>}, {transform_indices = @transform_2, window_bounds = array<i64: 8, 2, 32>}]} {
    %c0 = arith.constant 0 : index
    %c0_0 = arith.constant 0 : index
    %c0_1 = arith.constant 0 : index
    %0 = vector.load %arg1[%c0, %c0_0, %c0_1] : memref<8x2x32xf32, #tpu.memory_space<vmem>>, vector<8x2x32xf32>
    %c0_2 = arith.constant 0 : index
    %c0_3 = arith.constant 0 : index
    %1 = vector.load %arg2[%c0_2, %c0_3] : memref<8x32xf32, #tpu.memory_space<vmem>>, vector<8x32xf32>
    %2 = vector.shape_cast %1 : vector<8x32xf32> to vector<8x1x32xf32>
    %3 = vector.broadcast %2 : vector<8x1x32xf32> to vector<8x2x32xf32>
    %4 = arith.addf %0, %3 : vector<8x2x32xf32>
    %c0_4 = arith.constant 0 : index
    %c0_5 = arith.constant 0 : index
    %c0_6 = arith.constant 0 : index
    %5 = vector.load %arg3[%c0_4, %c0_5, %c0_6] : memref<8x2x32xf32, #tpu.memory_space<vmem>>, vector<8x2x32xf32>
    tpu.vector_store %arg3[%c0_4, %c0_5, %c0_6], %4 {strides = array<i32>} : memref<8x2x32xf32, #tpu.memory_space<vmem>>, vector<8x2x32xf32>,
    return
  }
  func.func @transform_0(%arg0: i32) -> (i32, i32, i32) {
    %c0_i32 = arith.constant 0 : i32
    %c0_i32_0 = arith.constant 0 : i32
    %c0_i32_1 = arith.constant 0 : i32
    return %arg0, %c0_i32, %c0_i32_0 : i32, i32, i32
  }
  func.func @transform_1(%arg0: i32) -> (i32, i32) {
    %c0_i32 = arith.constant 0 : i32
    %c0_i32_0 = arith.constant 0 : i32
    return %arg0, %c0_i32 : i32, i32
  }
  func.func @transform_2(%arg0: i32) -> (i32, i32, i32) {
    %c0_i32 = arith.constant 0 : i32
    %c0_i32_0 = arith.constant 0 : i32
    %c0_i32_1 = arith.constant 0 : i32
    return %arg0, %c0_i32, %c0_i32_0 : i32, i32, i32
  }
}

</mosaic_0001>

<bundles_post_ra>
// kernel: tpu_custom_call.1
= control target key start
LH: loop header
LB: loop body
LE: loop exit
PB: predicated region body
PF: predicated region fallthrough
CT: control target
= control target key end

     0   :  { %7 = vsyncpa [#allocation3], 0  ;;  %s238_s0 = inlined_call_operand.hbm [shape: f32[8,2,32], index: 0, kind: input, shape index: {}]   ;;  %s239_s1 = inlined_call_operand.hbm [shape: f32[8,32], index: 1, kind: input, shape index: {}]   ;;  %s240_s2 = inlined_call_operand.hbm [shape: f32[8,2,32], index: 2, kind: output, shape index: {}]  }
   0x1   :  { %8 = vsyncpa [#allocation6], 0 }
   0x2   :  { %9 = vsyncpa [#allocation4], 0  ;;  %s14_s11 = sshll.u32 %s238_s0, 4  ;;  %s195_s12 = smov [#allocation2]   ;;  %s15_s11 = int_to_ptr.hbm [resolvable:$true] %s14_s11 }
   0x3   :  { %s16_s13 = sshll.u32 %s195_s12, 4  ;;  %s28_s16 = sshll.u32 %s239_s1, 4  ;;  %s17_s13 = int_to_ptr.vmem [resolvable:$true] %s16_s13  ;;  %s29_s16 = int_to_ptr.hbm [resolvable:$true] %s28_s16 }
   0x4   :  { %s196_s17 = smov 32   ;;  %s197_s18 = smov 2  }
   0x5   :  { %22 = dma.hbm_to_vmem [thread:$0]  %s15_s11, 256, %s17_s13, [#allocation3], %s196_s17, %s196_s17, %s197_s18  }
   0x6   :  { %s198_s19 = smov [#allocation5]  }
   0x7   :  { %s30_s20 = sshll.u32 %s198_s19, 4  ;;  %s31_s20 = int_to_ptr.vmem [resolvable:$true] %s30_s20 }
   0x8   :  { %33 = dma.hbm_to_vmem [thread:$0]  %s29_s16, 128, %s31_s20, [#allocation6]  }
   0x9   :  { %189 = dma.done.wait [#allocation3], 256  }
   0xa   :  { %190 = vsyncadd [#allocation3], 4294967040 }
   0xb   :  { %191 = dma.done.wait [#allocation6], 128  }
   0xc   :  { %192 = vsyncadd [#allocation6], 4294967168  ;;  %v42_v0 = vld [vmem:[#allocation2] sm:$0x3]  ;;  %v50_v1 = vld [vmem:[#allocation5] sm:$0xff]  ;;  %vm83_vm0 = vcmask 254976  }
   0xd   :  { %v59_v2 = vperm.slane %v50_v1, 0  ;;  %v43_v3 = vld [vmem:[#allocation2 + $0x2] sm:$0x3]  ;;  %v52_v4 = vrot.slane %v50_v1, 1  ;;  %v53_v5 = vrot.slane %v50_v1, 2  ;;  %v54_v6 = vrot.slane %v50_v1, 3 }
   0xe   :  { %v44_v7 = vld [vmem:[#allocation2 + $0x4] sm:$0x3]  ;;  %v45_v8 = vld [vmem:[#allocation2 + $0x6] sm:$0x3]  ;;  %v55_v9 = vrot.slane %v50_v1, 4  ;;  %v56_v10 = vrot.slane %v50_v1, 5 }
   0xf   :  { %v75_v11 = vadd.f32 %v59_v2, %v42_v0  ;;  %v60_v12 = vperm.slane %v52_v4, 0  ;;  %v61_v13 = vperm.slane %v53_v5, 0  ;;  %v62_v14 = vperm.slane %v54_v6, 0  ;;  %v46_v15 = vld [vmem:[#allocation2 + $0x8] sm:$0x3]  ;;  %s199_s0 = smov [#allocation7]  }
  0x10   :  { %v63_v16 = vperm.slane %v55_v9, 0  ;;  %v47_v17 = vld [vmem:[#allocation2 + $0xa] sm:$0x3]  ;;  %v64_v18 = vperm.slane %v56_v10, 0  ;;  %v57_v19 = vrot.slane %v50_v1, 6  ;;  %v58_v20 = vrot.slane %v50_v1, 7 }
  0x11   :  { %84 = vst.msk [vmem:[#allocation7] sm:$0x3] %vm83_vm0, %v75_v11  ;;  %v76_v21 = vadd.f32 %v60_v12, %v43_v3  ;;  %v77_v22 = vadd.f32 %v61_v13, %v44_v7  ;;  %v78_v23 = vadd.f32 %v62_v14, %v45_v8  ;;  %v48_v24 = vld [vmem:[#allocation2 + $0xc] sm:$0x3]  ;;  %v49_v27 = vld [vmem:[#allocation2 + $0xe] sm:$0x3] }
  0x12   :  { %v79_v25 = vadd.f32 %v63_v16, %v46_v15  ;;  %v65_v26 = vperm.slane %v57_v19, 0  ;;  %v66_v28 = vperm.slane %v58_v20, 0  ;;  %v80_v29 = vadd.f32 %v64_v18, %v47_v17  ;;  %s96_s1 = sshll.u32 %s199_s0, 4  ;;  %s98_s23 = sshll.u32 %s240_s2, 4  ;;  %s97_s1 = int_to_ptr.vmem [resolvable:$true] %s96_s1  ;;  %s99_s23 = int_to_ptr.hbm [resolvable:$true] %s98_s23 }
  0x13   :  { %85 = vst.msk [vmem:[#allocation7 + $0x2] sm:$0x3] %vm83_vm0, %v76_v21 }
  0x14   :  { %86 = vst.msk [vmem:[#allocation7 + $0x4] sm:$0x3] %vm83_vm0, %v77_v22  ;;  %v81_v30 = vadd.f32 %v65_v26, %v48_v24  ;;  %v82_v31 = vadd.f32 %v66_v28, %v49_v27 }
  0x15   :  { %87 = vst.msk [vmem:[#allocation7 + $0x6] sm:$0x3] %vm83_vm0, %v78_v23 }
  0x16   :  { %88 = vst.msk [vmem:[#allocation7 + $0x8] sm:$0x3] %vm83_vm0, %v79_v25 }
  0x17   :  { %89 = vst.msk [vmem:[#allocation7 + $0xa] sm:$0x3] %vm83_vm0, %v80_v29 }
  0x18   :  { %90 = vst.msk [vmem:[#allocation7 + $0xc] sm:$0x3] %vm83_vm0, %v81_v30 }
  0x19   :  { %91 = vst.msk [vmem:[#allocation7 + $0xe] sm:$0x3] %vm83_vm0, %v82_v31 }
  0x1a   :  { %104 = dma.vmem_to_hbm [thread:$0]  %s97_s1, 256, %s99_s23, [#allocation4], %s196_s17, %s196_s17, %s197_s18  }
  0x1b   :  { %193 = dma.done.wait [#allocation4], 256  }
  0x1c   :  { %194 = vsyncadd [#allocation4], 4294967040 }
  0x1d   :  { %109 = vsyncpa [#allocation3], 1 }
  0x1e   :  { %110 = vsyncpa [#allocation6], 1 }
  0x1f   :  { %111 = vsyncpa [#allocation4], 1 }

</bundles_post_ra>
